<compile_context>
chip_gen: v6e
topology: v6e:2x2x1
jax: 0.10.0
libtpu: 0.0.40
codegen_flags: <defaults>
</compile_context>

<pallas_src>
import functools
import math

import jax
import jax.numpy as jnp
from jax.experimental import pallas as pl
from jax.experimental.pallas import tpu as pltpu

_NEG = -1.0e30  # finite mask sentinel (avoids -inf arithmetic edge cases when tiling)


def _layernorm(x, g, b, eps=1e-5):
    mu = jnp.mean(x, axis=-1, keepdims=True)
    var = jnp.mean((x - mu) ** 2, axis=-1, keepdims=True)
    return (x - mu) * jax.lax.rsqrt(var + eps) * g + b


def _gelu_tanh(u):
    # GELU(approximate='tanh'): 0.5*u*(1+tanh(sqrt(2/pi)*(u + 0.044715*u^3)))
    return 0.5 * u * (1.0 + jnp.tanh(0.7978845608028654 * (u + 0.044715 * u * u * u)))


def _pick_block(dim, target, granule=128):
    """Largest tile <= target that divides dim (multiple of `granule`), else dim."""
    if dim <= target:
        return dim
    t = (min(target, dim) // granule) * granule
    while t >= granule:
        if dim % t == 0:
            return t
        t -= granule
    return dim


# ---------------------------------------------------------------------------
# Stage 1: LN1 + fused QKV projection.  grid = (B, q_tiles, n_tiles); the 3E
# output dim of Wqkv is streamed (parallel) so only an (E, TN) weight slab is
# resident.  LN is recomputed per n-tile (cheap vs. the matmul) so every grid
# axis stays "parallel" (megacore-friendly, no cross-step scratch state).
# ---------------------------------------------------------------------------
def ln_qkv_kernel(x_ref, g_ref, b_ref, wqkv_ref, qkv_ref, *, compute_dtype):
    x = x_ref[...].astype(jnp.float32)                        # (TQ, E)
    h = _layernorm(x, g_ref[0], b_ref[0]).astype(compute_dtype)
    qkv_ref[...] = jnp.dot(h, wqkv_ref[...].astype(compute_dtype),
                           preferred_element_type=jnp.float32
                           ).astype(qkv_ref.dtype)            # (TQ, TN)


# ---------------------------------------------------------------------------
# Stage 2: flash attention over only the lower-triangular (qi, ki) tile pairs.
# grid = (B, H, n_pairs); qi/ki come from scalar-prefetched SMEM tables.
# ---------------------------------------------------------------------------
def flash_attn_kernel(qi_tbl, ki_tbl, q_ref, k_ref, v_ref, o_ref,
                      m_sc, l_sc, acc_sc, *, scale, compute_dtype, tq, tk, nk):
    p = pl.program_id(2)
    qi = qi_tbl[p]
    ki = ki_tbl[p]

    @pl.when(ki == 0)
    def _init():
        m_sc[...] = jnp.full_like(m_sc, _NEG)
        l_sc[...] = jnp.zeros_like(l_sc)
        acc_sc[...] = jnp.zeros_like(acc_sc)

    # Fold 1/sqrt(hd) into q (TQ*hd mults) instead of scaling the (TQ,TK) score tile.
    q = (q_ref[...].astype(jnp.float32) * scale).astype(compute_dtype)   # (TQ, hd)
    k = k_ref[...].astype(compute_dtype)                                 # (TK, hd)
    v = v_ref[...].astype(compute_dtype)                                 # (TK, hd)

    # No explicit k.T: contract dim 1 of both operands (MXU absorbs it).
    s = jax.lax.dot_general(q, k, (((1,), (1,)), ((), ())),
                            preferred_element_type=jnp.float32)          # (TQ, TK)

    # Causal mask from tile offsets only (finite sentinel; softmax math stays f32).
    row = qi * tq + jax.lax.broadcasted_iota(jnp.int32, (tq, tk), 0)
    col = ki * tk + jax.lax.broadcasted_iota(jnp.int32, (tq, tk), 1)
    s = jnp.where(col <= row, s, _NEG)

    m_prev = m_sc[...]                                                   # (TQ, 1)
    m_new = jnp.maximum(m_prev, jnp.max(s, axis=-1, keepdims=True))
    alpha = jnp.exp(m_prev - m_new)
    p_mat = jnp.exp(s - m_new)                                           # (TQ, TK)
    l_sc[...] = alpha * l_sc[...] + jnp.sum(p_mat, axis=-1, keepdims=True)
    acc_sc[...] = alpha * acc_sc[...] + jnp.dot(
        p_mat.astype(compute_dtype), v, preferred_element_type=jnp.float32)
    m_sc[...] = m_new

    # Last kv tile for this q row (pairs are ordered ki-ascending within each qi).
    last_ki = jnp.minimum(nk - 1, (qi * tq + tq - 1) // tk)

    @pl.when(ki == last_ki)
    def _finalize():
        inv_l = pl.reciprocal(l_sc[...], approx=True)       # EUP slot, off the VPU path
        o_ref[...] = (acc_sc[...] * inv_l).astype(o_ref.dtype)


# ---------------------------------------------------------------------------
# Stage 3: residual + LN2 + MLP + residual.  grid = (B, q_tiles, f_tiles);
# the 4E hidden dim is streamed ("arbitrary", innermost) with W1/W2 slabs per
# step and a (TQ, E) f32 accumulator in VMEM scratch.
# ---------------------------------------------------------------------------
def mlp_resid_kernel(x_ref, a_ref, g_ref, b_ref, w1_ref, w2_ref, o_ref,
                     h_sc, acc_sc, *, compute_dtype):
    f = pl.program_id(2)
    nf = pl.num_programs(2)

    @pl.when(f == 0)
    def _init():
        x1 = x_ref[...].astype(jnp.float32) + a_ref[...].astype(jnp.float32)
        h_sc[...] = _layernorm(x1, g_ref[0], b_ref[0]).astype(h_sc.dtype)
        acc_sc[...] = jnp.zeros_like(acc_sc)

    u = jnp.dot(h_sc[...], w1_ref[...].astype(compute_dtype),
                preferred_element_type=jnp.float32)           # (TQ, TF), f32 GELU
    acc_sc[...] += jnp.dot(_gelu_tanh(u).astype(compute_dtype),
                           w2_ref[...].astype(compute_dtype),
                           preferred_element_type=jnp.float32)

    @pl.when(f == nf - 1)
    def _finalize():
        # TODO(synk): attn/resid/mlp dropout omitted (eval-mode identity).
        x1 = x_ref[...].astype(jnp.float32) + a_ref[...].astype(jnp.float32)
        o_ref[...] = (x1 + acc_sc[...]).astype(o_ref.dtype)


# ---------------------------------------------------------------------------
# Wrapper
# ---------------------------------------------------------------------------
def decoder_block(x, ln1_g, ln1_b, wqkv_t, ln2_g, ln2_b, w1_t, w2_t, *, n_head,
                  q_block=256, kv_block=256,      # 256-wide MXU on v6e/v7x; use 128-256 on v5e
                  n_block=1536, f_block=2048,     # weight-streaming tile targets
                  compute_dtype=jnp.bfloat16,     # MXU operands (f32 accumulate)
                  vmem_limit_bytes=48 * 1024 * 1024):   # headroom under v7x's 64 MiB/TC
    B, T, E = x.shape
    F = w1_t.shape[1]
    assert wqkv_t.shape == (E, 3 * E) and w2_t.shape == (F, E)
    assert E % n_head == 0
    hd = E // n_head
    scale = 1.0 / math.sqrt(hd)

    ln1_g = jnp.reshape(ln1_g, (1, E)); ln1_b = jnp.reshape(ln1_b, (1, E))
    ln2_g = jnp.reshape(ln2_g, (1, E)); ln2_b = jnp.reshape(ln2_b, (1, E))

    TQ = min(q_block, T)
    TK = min(kv_block, T)
    assert T % TQ == 0 and T % TK == 0, "sequence length must divide the tile sizes"
    nq, nk = T // TQ, T // TK
    TN = _pick_block(3 * E, n_block)   # qkv output-dim tile
    TF = _pick_block(F, f_block)       # mlp hidden-dim tile
    nn, nf = (3 * E) // TN, F // TF

    def cparams(sem):
        return pltpu.CompilerParams(dimension_semantics=sem,
                                    vmem_limit_bytes=vmem_limit_bytes)

    # ---- stage 1: ln1 + fused qkv (Wqkv streamed along its 3E output dim) ----------
    qkv = pl.pallas_call(
        functools.partial(ln_qkv_kernel, compute_dtype=compute_dtype),
        out_shape=jax.ShapeDtypeStruct((B, T, 3 * E), x.dtype),
        grid_spec=pltpu.PrefetchScalarGridSpec(
            num_scalar_prefetch=0,
            grid=(B, nq, nn),
            in_specs=[
                pl.BlockSpec((None, TQ, E), lambda b, i, n: (b, i, 0)),   # x rows (resident over n)
                pl.BlockSpec((1, E), lambda b, i, n: (0, 0)),             # ln1 gamma
                pl.BlockSpec((1, E), lambda b, i, n: (0, 0)),             # ln1 beta
                pl.BlockSpec((E, TN), lambda b, i, n: (0, n)),            # Wqkv^T slab (streamed)
            ],
            out_specs=pl.BlockSpec((None, TQ, TN), lambda b, i, n: (b, i, n)),
        ),
        compiler_params=cparams(("parallel", "parallel", "parallel")),
    )(x, ln1_g, ln1_b, wqkv_t)

    # ---- stage 2: flash attention over only the causal (lower-triangular) tile pairs
    pairs = [(i, j) for i in range(nq) for j in range(nk) if j * TK <= i * TQ + TQ - 1]
    qi_tbl = jnp.asarray([pr[0] for pr in pairs], dtype=jnp.int32)
    ki_tbl = jnp.asarray([pr[1] for pr in pairs], dtype=jnp.int32)
    n_pairs = len(pairs)

    attn_kernel = functools.partial(flash_attn_kernel, scale=scale,
                                    compute_dtype=compute_dtype, tq=TQ, tk=TK, nk=nk)
    attn_scratch = [pltpu.VMEM((TQ, 1), jnp.float32),    # running max
                    pltpu.VMEM((TQ, 1), jnp.float32),    # running sum
                    pltpu.VMEM((TQ, hd), jnp.float32)]   # output accumulator
    attn_sem = ("parallel", "parallel", "arbitrary")

    if hd % 128 == 0:
        # Fast path: index the packed (B,T,3E) qkv and the (B,T,E) output directly --
        # no wrapper-side head split/merge transposes (saves ~7*B*T*E of HBM traffic),
        # and the attention output store is lane-dense.
        # TODO(synk): consider pipeline_mode=pl.Buffered(3) on K/V if DMA is still exposed.
        a = pl.pallas_call(
            attn_kernel,
            out_shape=jax.ShapeDtypeStruct((B, T, E), x.dtype),
            grid_spec=pltpu.PrefetchScalarGridSpec(
                num_scalar_prefetch=2,
                grid=(B, n_head, n_pairs),
                in_specs=[
                    pl.BlockSpec((None, TQ, hd),
                                 lambda b, h, p, qt, kt: (b, qt[p], h)),             # Q
                    pl.BlockSpec((None, TK, hd),
                                 lambda b, h, p, qt, kt, H=n_head: (b, kt[p], H + h)),      # K
                    pl.BlockSpec((None, TK, hd),
                                 lambda b, h, p, qt, kt, H=n_head: (b, kt[p], 2 * H + h)),  # V
                ],
                out_specs=pl.BlockSpec((None, TQ, hd),
                                       lambda b, h, p, qt, kt: (b, qt[p], h)),
                scratch_shapes=attn_scratch,
            ),
            compiler_params=cparams(attn_sem),
        )(qi_tbl, ki_tbl, qkv, qkv, qkv)
    else:
        # Fallback for head_dim not 128-aligned: cheap wrapper-side layout plumbing
        # (matches PyTorch .view(b,t,h,hd).transpose(1,2) and its inverse).
        # TODO(synk): pack multiple heads per grid step when hd < 128 for lane-dense stores.
        qkv_heads = qkv.reshape(B, T, 3, n_head, hd).transpose(2, 0, 3, 1, 4)
        q, k, v = qkv_heads[0], qkv_heads[1], qkv_heads[2]
        a_heads = pl.pallas_call(
            attn_kernel,
            out_shape=jax.ShapeDtypeStruct((B, n_head, T, hd), x.dtype),
            grid_spec=pltpu.PrefetchScalarGridSpec(
                num_scalar_prefetch=2,
                grid=(B, n_head, n_pairs),
                in_specs=[
                    pl.BlockSpec((None, None, TQ, hd),
                                 lambda b, h, p, qt, kt: (b, h, qt[p], 0)),
                    pl.BlockSpec((None, None, TK, hd),
                                 lambda b, h, p, qt, kt: (b, h, kt[p], 0)),
                    pl.BlockSpec((None, None, TK, hd),
                                 lambda b, h, p, qt, kt: (b, h, kt[p], 0)),
                ],
                out_specs=pl.BlockSpec((None, None, TQ, hd),
                                       lambda b, h, p, qt, kt: (b, h, qt[p], 0)),
                scratch_shapes=attn_scratch,
            ),
            compiler_params=cparams(attn_sem),
        )(qi_tbl, ki_tbl, q, k, v)
        a = a_heads.transpose(0, 2, 1, 3).reshape(B, T, E)

    # NOTE: the reference's use_fast path never applies the output projection self.o.

    # ---- stage 3: residual + ln2 + mlp (hidden dim streamed through the grid) + residual
    out = pl.pallas_call(
        functools.partial(mlp_resid_kernel, compute_dtype=compute_dtype),
        out_shape=jax.ShapeDtypeStruct((B, T, E), x.dtype),
        grid_spec=pltpu.PrefetchScalarGridSpec(
            num_scalar_prefetch=0,
            grid=(B, nq, nf),
            in_specs=[
                pl.BlockSpec((None, TQ, E), lambda b, i, f: (b, i, 0)),   # x (resident over f)
                pl.BlockSpec((None, TQ, E), lambda b, i, f: (b, i, 0)),   # attention out
                pl.BlockSpec((1, E), lambda b, i, f: (0, 0)),             # ln2 gamma
                pl.BlockSpec((1, E), lambda b, i, f: (0, 0)),             # ln2 beta
                pl.BlockSpec((E, TF), lambda b, i, f: (0, f)),            # W1^T slab (streamed)
                pl.BlockSpec((TF, E), lambda b, i, f: (f, 0)),            # W2^T slab (streamed)
            ],
            out_specs=pl.BlockSpec((None, TQ, E), lambda b, i, f: (b, i, 0)),
            scratch_shapes=[pltpu.VMEM((TQ, E), compute_dtype),           # ln2(x1) cache
                            pltpu.VMEM((TQ, E), jnp.float32)],            # MLP accumulator
        ),
        compiler_params=cparams(("parallel", "parallel", "arbitrary")),
    )(x, a, ln2_g, ln2_b, w1_t, w2_t)
    return out


# ---------------------------------------------------------------------------
# Pure-JAX reference (eval-mode DecoderBlock, use_fast path)
# ---------------------------------------------------------------------------
def _ref_decoder_block(x, ln1_g, ln1_b, wqkv_t, ln2_g, ln2_b, w1_t, w2_t, *, n_head):
    B, T, E = x.shape
    hd = E // n_head
    h = _layernorm(x, ln1_g.reshape(-1), ln1_b.reshape(-1))
    q, k, v = jnp.split(h @ wqkv_t, 3, axis=-1)
    def heads(t):
        return t.reshape(B, T, n_head, hd).transpose(0, 2, 1, 3)
    q, k, v = heads(q), heads(k), heads(v)
    s = jnp.einsum('bhqd,bhkd->bhqk', q, k) / math.sqrt(hd)
    mask = jnp.tril(jnp.ones((T, T), dtype=bool))
    s = jnp.where(mask, s, -jnp.inf)
    p = jax.nn.softmax(s, axis=-1)
    a = jnp.einsum('bhqk,bhkd->bhqd', p, v).transpose(0, 2, 1, 3).reshape(B, T, E)
    x1 = x + a
    h2 = _layernorm(x1, ln2_g.reshape(-1), ln2_b.reshape(-1))
    return x1 + _gelu_tanh(h2 @ w1_t) @ w2_t


if __name__ == "__main__":
    key = jax.random.PRNGKey(0)

    def make_params(k, E, F):
        kq, kk, kv, k1, k2 = jax.random.split(k, 5)
        # PyTorch Linear weight is (out, in); pass W.T so the kernel computes x @ W.T.
        wq = (0.02 * jax.random.normal(kq, (E, E), jnp.float32)).T
        wk = (0.02 * jax.random.normal(kk, (E, E), jnp.float32)).T
        wv = (0.02 * jax.random.normal(kv, (E, E), jnp.float32)).T
        wqkv = jnp.concatenate([wq, wk, wv], axis=1)                        # (E, 3E) fused
        w1 = (0.02 * jax.random.normal(k1, (F, E), jnp.float32)).T          # (E, 4E)
        w2 = (0.02 * jax.random.normal(k2, (E, F), jnp.float32)).T          # (4E, E)
        ln_g = jnp.ones((1, E), jnp.float32)
        ln_b = jnp.zeros((1, E), jnp.float32)
        return ln_g, ln_b, wqkv, ln_g, ln_b, w1, w2

    kA, kB = jax.random.split(key)

    # Case A: head_dim = 128 -> transpose-free attention path, bf16 MXU operands,
    # multi-tile kv (causal pair list), streamed Wqkv (3 tiles) and W1/W2 (2 F-tiles).
    B, T, E, H = 2, 128, 256, 2
    F = 4 * E
    kxA, kpA = jax.random.split(kA)
    xA = jax.random.normal(kxA, (B, T, E), jnp.float32)
    g1, b1, wqkv, g2, b2, w1, w2 = make_params(kpA, E, F)
    outA = decoder_block(xA, g1, b1, wqkv.astype(jnp.bfloat16), g2, b2,
                         w1.astype(jnp.bfloat16), w2.astype(jnp.bfloat16),
                         n_head=H, q_block=64, kv_block=64, n_block=256, f_block=512,
                         compute_dtype=jnp.bfloat16)
    outA = jax.block_until_ready(outA)
    refA = _ref_decoder_block(xA, g1, b1, wqkv, g2, b2, w1, w2, n_head=H)
    errA = float(jnp.max(jnp.abs(outA.astype(jnp.float32) - refA)))
    assert outA.shape == (B, T, E) and outA.dtype == jnp.float32
    assert errA < 5e-2, f"case A (bf16) max abs err {errA}"

    # Case B: tiny shapes, head_dim = 8 -> fallback head split/merge path, f32 compute.
    B, T, E, H = 2, 16, 32, 4
    F = 4 * E
    kxB, kpB = jax.random.split(kB)
    xB = jax.random.normal(kxB, (B, T, E), jnp.float32)
    g1, b1, wqkv, g2, b2, w1, w2 = make_params(kpB, E, F)
    outB = decoder_block(xB, g1, b1, wqkv, g2, b2, w1, w2,
                         n_head=H, compute_dtype=jnp.float32)
    outB = jax.block_until_ready(outB)
    refB = _ref_decoder_block(xB, g1, b1, wqkv, g2, b2, w1, w2, n_head=H)
    errB = float(jnp.max(jnp.abs(outB - refB)))
    assert outB.shape == (B, T, E) and outB.dtype == jnp.float32
    assert errB < 2e-2, f"case B (f32) max abs err {errB}"

    print("KERNEL_OK")
</pallas_src>

<mosaic_0001>
module attributes {stable_mosaic.version = 11 : i64} {
  func.func @ln_qkv_kernel(%arg0: i32, %arg1: i32, %arg2: i32, %arg3: memref<1x64x256xf32, #tpu.memory_space<vmem>>, %arg4: memref<1x256xf32, #tpu.memory_space<vmem>>, %arg5: memref<1x256xf32, #tpu.memory_space<vmem>>, %arg6: memref<256x256xbf16, #tpu.memory_space<vmem>>, %arg7: memref<1x64x256xf32, #tpu.memory_space<vmem>>) attributes {dimension_semantics = [#tpu.dimension_semantics<parallel>, #tpu.dimension_semantics<parallel>, #tpu.dimension_semantics<parallel>], iteration_bounds = array<i64: 2, 2, 3>, scalar_prefetch = 0 : i64, scratch_operands = 0 : i64, tpu.core_type = #tpu.core_type<tc>, window_params = [{transform_indices = @transform_0, window_bounds = array<i64: 1, 64, 256>}, {pipeline_mode = #tpu.pipeline_mode<synchronous>, transform_indices = @transform_1, window_bounds = array<i64: 1, 256>}, {pipeline_mode = #tpu.pipeline_mode<synchronous>, transform_indices = @transform_2, window_bounds = array<i64: 1, 256>}, {transform_indices = @transform_3, window_bounds = array<i64: 256, 256>}, {transform_indices = @transform_4, window_bounds = array<i64: 1, 64, 256>}]} {
    %c0 = arith.constant 0 : index
    %c0_0 = arith.constant 0 : index
    %c0_1 = arith.constant 0 : index
    %0 = vector.load %arg3[%c0, %c0_0, %c0_1] : memref<1x64x256xf32, #tpu.memory_space<vmem>>, vector<1x64x256xf32>
    %1 = vector.shape_cast %0 : vector<1x64x256xf32> to vector<64x256xf32>
    %c0_2 = arith.constant 0 : index
    %c0_3 = arith.constant 0 : index
    %2 = vector.load %arg4[%c0_2, %c0_3] : memref<1x256xf32, #tpu.memory_space<vmem>>, vector<1x256xf32>
    %3 = vector.shape_cast %2 : vector<1x256xf32> to vector<256xf32>
    %c0_4 = arith.constant 0 : index
    %c0_5 = arith.constant 0 : index
    %4 = vector.load %arg5[%c0_4, %c0_5] : memref<1x256xf32, #tpu.memory_space<vmem>>, vector<1x256xf32>
    %5 = vector.shape_cast %4 : vector<1x256xf32> to vector<256xf32>
    %cst = arith.constant dense<0.000000e+00> : vector<64xf32>
    %6 = vector.multi_reduction <add>, %1, %cst [1] : vector<64x256xf32> to vector<64xf32>
    %7 = vector.shape_cast %6 : vector<64xf32> to vector<64x1xf32>
    %cst_6 = arith.constant 2.560000e+02 : f32
    %8 = vector.broadcast %cst_6 : f32 to vector<64x1xf32>
    %9 = arith.divf %7, %8 : vector<64x1xf32>
    %10 = vector.broadcast %9 : vector<64x1xf32> to vector<64x256xf32>
    %11 = arith.subf %1, %10 : vector<64x256xf32>
    %12 = arith.mulf %11, %11 : vector<64x256xf32>
    %cst_7 = arith.constant dense<0.000000e+00> : vector<64xf32>
    %13 = vector.multi_reduction <add>, %12, %cst_7 [1] : vector<64x256xf32> to vector<64xf32>
    %14 = vector.shape_cast %13 : vector<64xf32> to vector<64x1xf32>
    %cst_8 = arith.constant 2.560000e+02 : f32
    %15 = vector.broadcast %cst_8 : f32 to vector<64x1xf32>
    %16 = arith.divf %14, %15 : vector<64x1xf32>
    %17 = vector.broadcast %9 : vector<64x1xf32> to vector<64x256xf32>
    %18 = arith.subf %1, %17 : vector<64x256xf32>
    %cst_9 = arith.constant 9.99999974E-6 : f32
    %19 = vector.broadcast %cst_9 : f32 to vector<64x1xf32>
    %20 = arith.addf %16, %19 : vector<64x1xf32>
    %21 = math.rsqrt %20 : vector<64x1xf32>
    %22 = vector.broadcast %21 : vector<64x1xf32> to vector<64x256xf32>
    %23 = arith.mulf %18, %22 : vector<64x256xf32>
    %24 = vector.shape_cast %3 : vector<256xf32> to vector<1x256xf32>
    %25 = vector.broadcast %24 : vector<1x256xf32> to vector<64x256xf32>
    %26 = arith.mulf %23, %25 : vector<64x256xf32>
    %27 = vector.shape_cast %5 : vector<256xf32> to vector<1x256xf32>
    %28 = vector.broadcast %27 : vector<1x256xf32> to vector<64x256xf32>
    %29 = arith.addf %26, %28 : vector<64x256xf32>
    %30 = arith.truncf %29 : vector<64x256xf32> to vector<64x256xbf16>
    %c0_10 = arith.constant 0 : index
    %c0_11 = arith.constant 0 : index
    %31 = vector.load %arg6[%c0_10, %c0_11] : memref<256x256xbf16, #tpu.memory_space<vmem>>, vector<256x256xbf16>
    %cst_12 = arith.constant dense<0.000000e+00> : vector<64x256xf32>
    %32 = tpu.matmul %30, %31, %cst_12 {dimension_numbers = #tpu.dot_dimension_numbers<[1], [0], [0], [1], [0, 0, 1, 1], [], []>} : vector<64x256xbf16>, vector<256x256xbf16>, vector<64x256xf32> -> vector<64x256xf32>
    %c0_13 = arith.constant 0 : index
    %c0_14 = arith.constant 0 : index
    %c0_15 = arith.constant 0 : index
    %33 = vector.load %arg7[%c0_13, %c0_14, %c0_15] : memref<1x64x256xf32, #tpu.memory_space<vmem>>, vector<1x64x256xf32>
    %34 = vector.shape_cast %33 : vector<1x64x256xf32> to vector<64x256xf32>
    %35 = vector.shape_cast %32 : vector<64x256xf32> to vector<1x64x256xf32>
    tpu.vector_store %arg7[%c0_13, %c0_14, %c0_15], %35 {strides = array<i32>} : memref<1x64x256xf32, #tpu.memory_space<vmem>>, vector<1x64x256xf32>,
    return
  }
  func.func @transform_0(%arg0: i32, %arg1: i32, %arg2: i32) -> (i32, i32, i32) {
    %c0_i32 = arith.constant 0 : i32
    %c0_i32_0 = arith.constant 0 : i32
    return %arg0, %arg1, %c0_i32 : i32, i32, i32
  }
  func.func @transform_1(%arg0: i32, %arg1: i32, %arg2: i32) -> (i32, i32) {
    %c0_i32 = arith.constant 0 : i32
    %c0_i32_0 = arith.constant 0 : i32
    %c0_i32_1 = arith.constant 0 : i32
    return %c0_i32, %c0_i32_0 : i32, i32
  }
  func.func @transform_2(%arg0: i32, %arg1: i32, %arg2: i32) -> (i32, i32) {
    %c0_i32 = arith.constant 0 : i32
    %c0_i32_0 = arith.constant 0 : i32
    %c0_i32_1 = arith.constant 0 : i32
    return %c0_i32, %c0_i32_0 : i32, i32
  }
  func.func @transform_3(%arg0: i32, %arg1: i32, %arg2: i32) -> (i32, i32) {
    %c0_i32 = arith.constant 0 : i32
    %c0_i32_0 = arith.constant 0 : i32
    return %c0_i32, %arg2 : i32, i32
  }
  func.func @transform_4(%arg0: i32, %arg1: i32, %arg2: i32) -> (i32, i32, i32) {
    %c0_i32 = arith.constant 0 : i32
    return %arg0, %arg1, %arg2 : i32, i32, i32
  }
}

</mosaic_0001>

<bundles_post_ra>
// kernel: tpu_custom_call.1
= control target key start
LH: loop header
LB: loop body
LE: loop exit
PB: predicated region body
PF: predicated region fallthrough
CT: control target
= control target key end

     0   :  { %s2145_s0 = inlined_call_operand.hbm [shape: f32[2,128,256], index: 0, kind: input, shape index: {}]   ;;  %s2146_s1 = inlined_call_operand.hbm [shape: f32[1,256], index: 1, kind: input, shape index: {}]   ;;  %s2147_s2 = inlined_call_operand.vmem [shape: f32[1,256], index: 2, kind: input, shape index: {}]   ;;  %s2148_s3 = inlined_call_operand.hbm [shape: bf16[256,768], index: 3, kind: input, shape index: {}]   ;;  %s2149_s4 = inlined_call_operand.hbm [shape: f32[2,128,768], index: 4, kind: output, shape index: {}]  }
   0x1   :  { %2160 = sst [smem:[#allocation23_spill]] %s2145_s0 }
   0x2   :  { %2161 = sst [smem:[#allocation24_spill]] %s2146_s1 }
   0x3   :  { %2162 = sst [smem:[#allocation25_spill]] %s2147_s2 }
   0x4   :  { %2163 = sst [smem:[#allocation26_spill]] %s2148_s3 }
   0x5   :  { %2164 = sst [smem:[#allocation27_spill]] %s2149_s4 }
   0x6   :  { %9 = vsyncpa [#allocation3], 0 }
   0x7   :  { %11 = vsyncpa [#allocation3 + $0x1], 0 }
   0x8   :  { %12 = vsyncpa [#allocation6], 0 }
   0x9   :  { %13 = vsyncpa [#allocation4], 0 }
   0xa   :  { %15 = vsyncpa [#allocation4 + $0x1], 0  ;;  %s1547_s15 = smov 0   ;;  %s1549_s16 = smov 0  }
   0xb   :  { %s1551_s17 = smov 0   ;;  %s1553_s18 = smov 0  }
   0xc   :  { %s1555_s19 = smov 0   ;;  %s1557_s20 = smov 0  }
   0xd   :  { %s1559_s21 = smov 0   ;;  %s1561_s22 = smov 0  }
   0xe   :  { %s1563_s23 = smov 0   ;;  %s1565_s24 = smov 0  }
   0xf   :  { %s1567_s25 = smov 0   ;;  %s1569_s26 = smov 0  }
  0x10   :  { %s1571_s27 = smov 0   ;;  %s1573_s28 = smov 0  }
  0x11   :  { %s1575_s29 = smov 0   ;;  %s1577_s30 = smov 0  }
  0x12 LB: > { %2165 = sst [smem:[#allocation13_spill]] %s1448_s15  ;;  %s33_s5 = sadd.s32 1, %s1496_s27  ;;  %s1508_s30 = sphi %s1577_s30, %s21_s30   ;;  %s1504_s29 = sphi %s1575_s29, %s2223_s29   ;;  %s1500_s28 = sphi %s1573_s28, %s2222_s28   ;;  %s1496_s27 = sphi %s1571_s27, %s2210_s27   ;;  %s1492_s26 = sphi %s1569_s26, %s2221_s26   ;;  %s1488_s25 = sphi %s1567_s25, %s2220_s25   ;;  %s1484_s24 = sphi %s1565_s24, %s2209_s24   ;;  %s1480_s23 = sphi %s1563_s23, %s2219_s23   ;;  %s1476_s22 = sphi %s1561_s22, %s2218_s22   ;;  %s1472_s21 = sphi %s1559_s21, %s2217_s21   ;;  %s1468_s20 = sphi %s1557_s20, %s2216_s20   ;;  %s1464_s19 = sphi %s1555_s19, %s2215_s19   ;;  %s1460_s18 = sphi %s1553_s18, %s2214_s18   ;;  %s1456_s17 = sphi %s1551_s17, %s2235_s17   ;;  %s1452_s16 = sphi %s1549_s16, %s2207_s16   ;;  %s1448_s15 = sphi %s1547_s15, %s2213_s15  }
  0x13   : > { %2166 = sst [smem:[#allocation14_spill]] %s1452_s16  ;;  %s36_s6 = sadd.s32 1, %s1500_s28 }
  0x14   : > { %2167 = sst [smem:[#allocation15_spill]] %s1456_s17  ;;  %p34_p0 = scmp.ge.s32.totalorder %s33_s5, 3 }
  0x15   : > { %2168 = sst [smem:[#allocation16_spill]] %s1484_s24  ;;  %s40_s7 = sadd.s32 1, %s1504_s29 }
  0x16   : > { %2169 = sst [smem:[#allocation17_spill]] %s1488_s25  ;;  %s49_s8 = sadd.s32 1, %s1480_s23 }
  0x17   : > { %2170 = sst [smem:[#allocation18_spill]] %s1492_s26  ;;  %p56_p1 = scmp.ne.s32.totalorder %s1480_s23, %s1476_s22 }
  0x18   : > { %2171 = sst [smem:[#allocation19_spill]] %s1496_s27  ;;  %s2225_s5 = smov (%p34_p0, %s33_s5), 0 }
  0x19   : > { %2172 = sst [smem:[#allocation20_spill]] %s2225_s5  ;;  %s2227_s6 = smov (!%p34_p0, %s36_s6), %s1500_s28 }
  0x1a   : > { %p57_p2 = scmp.eq.s32.totalorder %s1508_s30, 0  ;;  %s1639_s9 = ssub.s32 %s1496_s27, %s2225_s5 }
  0x1b   : > { %p38_p3 = scmp.ge.s32.totalorder %s2227_s6, 2  ;;  %p115_p4 = scmp.eq.s32.totalorder %s1639_s9, 0 }
  0x1c   : > { %p1644_p5 = por %p57_p2, %p56_p1  ;;  %p1054_p6 = scmp.lt.s32.totalorder %s1508_s30, 12 }
  0x1d   : > { %s2229_s6 = smov (%p38_p3, %s2227_s6), 0  ;;  %s2231_s7 = smov (!%p38_p3, %s40_s7), %s1504_s29 }
  0x1e   : > { %2174 = sst [smem:[#allocation21_spill]] %s2229_s6  ;;  %s45_s11 = ssub.s32 %s1500_s28, %s2229_s6 }
  0x1f   : > { %p42_p7 = scmp.ge.s32.totalorder %s2231_s7, 2  ;;  %s198_s12 = sand.u32 1, %s1508_s30  }
  0x20   : > { %s200_s13 = sand.u32 1, %s1480_s23   ;;  %s992_s5 = sshll.u32 %s1500_s28, 4 }
  0x21   : > { %s2233_s7 = smov (%p42_p7, %s2231_s7), 0  ;;  %s940_s14 = sshll.u32 %s200_s13, 7 }
  0x22   : > { %2175 = sst [smem:[#allocation22_spill]] %s2233_s7  ;;  %s44_s4 = ssub.s32 %s1504_s29, %s2233_s7 }
  0x23   : > { %s46_s26 = sor.u32 %s45_s11, %s44_s4  ;;  %s943_s24 = sshll.u32 %s1504_s29, 5 }
  0x24   : > { %p47_p8 = scmp.eq.s32.totalorder %s46_s26, 0  ;;  %s144_s25 = sor.u32 %s1639_s9, %s46_s26 }
  0x25   : > { %p1663_p9 = scmp.eq.s32.totalorder %s144_s25, 0  ;;  %s209_s6 = sadd.s32 %s992_s5, %s943_s24 }
  0x26   : > { %s1668_s1 = scalar_select %p47_p8, %s1480_s23, %s49_s8  }
  0x27   : > { %s944_s3 = sshll.u32 %s209_s6, 7  ;;  %s202_s27 = scalar_lea.vmem [#allocation2], %s940_s14 }
  0x28   : > { %s212_s15 = sshll.u32 %s202_s27, 4  ;;  %s2177_s0 = sld [smem:[#allocation23_spill]]  ;;  %s213_s15 = int_to_ptr.vmem [resolvable:$true] %s212_s15 }
  0x29   : > { %p1677_p10 = pnand %p1054_p6, %p1644_p5  ;;  %s1681_s25 = scalar_lea.sflag [#allocation3], %s198_s12 }
  0x2a   : > { %s1271_s24 = scalar_lea.vmem %s213_s15, 2048  ;;  %s1510_s26 = smov [#allocation2]  }
  0x2b   : > { %p1260_p11 = pneg %p1677_p10  ;;  %p1272_p12 = scmp.ne.s32.totalorder %s213_s15, %s1271_s24 }
  0x2c   : > { %s1276_s27 = sshll.u32 %s1510_s26, 4  ;;  %s1277_s27 = int_to_ptr.vmem [resolvable:$false] %s1276_s27 }
  0x2d   : > { %p1274_p13 = pnand %p1272_p12, %p1260_p11  ;;  %p1279_p1 = scmp.lt.s32.totalorder %s213_s15, %s1277_s27 }
  0x2e   : > { %s211_s13 = scalar_lea.hbm %s2177_s0, %s944_s3  ;;  %s1278_s3 = scalar_lea.vmem %s1277_s27, 4096 }
  0x2f   : > { %p1275_p0 = pneg %p1274_p13  ;;  %p1280_p3 = scmp.lt.s32.totalorder %s1278_s3, %s1271_s24 }
  0x31   : > { %p1281_p7 = por %p1280_p3, %p1279_p1 }
  0x33   : > { %p1282_p5 = pnand %p1281_p7, %p1275_p0 }
  0x35   : > { %1285 = shalt.err (!%p1282_p5)
}
  0x36   : > { %s1511_s16 = smov 256   ;;  %s2179_s17 = sld [smem:[#allocation15_spill]] }
  0x37   : > { %s2180_s5 = sld [smem:[#allocation14_spill]]  ;;  %s1512_s6 = smov 16  }
  0x38   : > { %1045 = dma.hbm_to_vmem [thread:$0]  (!%p1677_p10), %s211_s13, 2048, %s213_s15, %s1681_s25, %s1511_s16, %s1511_s16, %s1512_s6  }
  0x39   : > { %s2181_s8 = sld [smem:[#allocation13_spill]]  ;;  %s1689_s10 = sadd.s32 4294967295, %s1508_s30  }
  0x3a   : > { %s936_s11 = sadd.s32 4294967294, %s1508_s30   ;;  %p62_p8 = scmp.ne.s32.totalorder %s1476_s22, %s1472_s21 }
  0x3b   : > { %p2157_p11 = scmp.eq.s32.totalorder %s1689_s10, 0  ;;  %s117_s12 = sadd.s32 1, %s1468_s20 }
  0x3c   : > { %p124_p12 = scmp.ne.s32.totalorder %s1468_s20, %s1464_s19  ;;  %p130_p10 = scmp.ne.s32.totalorder %s1464_s19, %s1460_s18 }
  0x3d   : > { %p1700_p13 = por %p2157_p11, %p62_p8  ;;  %s147_s4 = sadd.s32 1, %s2179_s17 }
  0x3e   : > { %s1709_s15 = scalar_select %p115_p4, %s1468_s20, %s117_s12  }
  0x3f   : > { %p1713_p0 = por %p124_p12, %p57_p2  ;;  %p1719_p1 = por %p130_p10, %p2157_p11 }
  0x40   : > { %p157_p3 = scmp.ne.s32.totalorder %s2179_s17, %s2180_s5  ;;  %s2235_s17 = smov (!%p1663_p9, %s2179_s17), %s147_s4 }
  0x41   : > { %p158_p4 = scmp.eq.s32.totalorder %s1689_s10, 11  ;;  %s2185_s18 = sld [smem:[#allocation19_spill]] }
  0x42   : > { %p163_p7 = scmp.ne.s32.totalorder %s2180_s5, %s2181_s8  ;;  %p164_p2 = scmp.eq.s32.totalorder %s936_s11, 11 }
  0x43   : > { %p937_p5 = scmp.ge.s32.totalorder %s1508_s30, 1  ;;  %p1735_p8 = por %p158_p4, %p157_p3 }
  0x44   : > { %p171_p12 = scmp.lt.s32.totalorder %s1508_s30, 13  ;;  %p1740_p10 = por %p164_p2, %p163_p7 }
  0x45   : > { %s2186_s9 = scalar_select %p1735_p8, 1, 0 }
  0x46   : > { %s2187_s24 = scalar_select %p1740_p10, 1, 0 }
  0x47   : > { %p1744_p11 = pnand %p937_p5, %p171_p12  ;;  %s1513_s2 = smov [#allocation5]  }
  0x48   : > { %s184_s27 = sshll.u32 %s1513_s2, 4  ;;  %p1752_p9 = pnand %p1054_p6, %p1713_p0  ;;  %s185_s27 = int_to_ptr.vmem [resolvable:$true] %s184_s27 }
  0x49   : > { %p1038_p3 = pneg %p1744_p11  ;;  %s224_s16 = sand.u32 1, %s1468_s20  }
  0x4a   : > { %p2190_p4 = scmp.eq.s32.totalorder %s1689_s10, 0  ;;  %s945_s6 = sshll.u32 %s224_s16, 8 }
  0x4b   : > { %s993_s8 = sshll.u32 %s2185_s18, 7  ;;  %s2192_s13 = sld [smem:[#allocation26_spill]] }
  0x4c   : > { %p1761_p7 = pnand %p1038_p3, %p2190_p4  ;;  %s1297_s2 = scalar_lea.vmem %s185_s27, 32 }
  0x4d   : > { %p1298_p0 = scmp.ne.s32.totalorder %s185_s27, %s1297_s2  ;;  %p1305_p12 = scmp.lt.s32.totalorder %s185_s27, %s185_s27 }
  0x4e   : > { %p1288_p6 = pneg %p1761_p7  ;;  %p1306_p10 = scmp.lt.s32.totalorder %s1297_s2, %s1297_s2 }
  0x50   : > { %p1300_p2 = pnand %p1298_p0, %p1288_p6  ;;  %p1307_p3 = por %p1306_p10, %p1305_p12 }
  0x51   : > { %s1769_s4 = scalar_lea.hbm %s2192_s13, %s993_s8 }
  0x52   : > { %p1301_p5 = pneg %p1300_p2 }
  0x54   : > { %p1308_p4 = pnand %p1307_p3, %p1301_p5 }
  0x56   : > { %1311 = shalt.err (!%p1308_p4)
}
  0x57   : > { %s2193_s0 = sld [smem:[#allocation24_spill]]  ;;  %s226_s8 = scalar_lea.vmem [#allocation7], %s945_s6 }
  0x58   : > { %s233_s11 = sshll.u32 %s226_s8, 4  ;;  %p1314_p8 = pneg %p1752_p9  ;;  %s234_s11 = int_to_ptr.vmem [resolvable:$true] %s233_s11 }
  0x59   : > { %s1325_s12 = scalar_lea.vmem %s234_s11, 4096  ;;  %s1514_s13 = smov [#allocation7]  }
  0x5a   : > { %p1326_p6 = scmp.ne.s32.totalorder %s234_s11, %s1325_s12  ;;  %s1330_s2 = sshll.u32 %s1514_s13, 4  ;;  %s1331_s2 = int_to_ptr.vmem [resolvable:$false] %s1330_s2 }
  0x5b   : > { %s1332_s7 = scalar_lea.vmem %s1331_s2, 8192  ;;  %p1333_p10 = scmp.lt.s32.totalorder %s234_s11, %s1331_s2 }
  0x5c   : > { %p1328_p0 = pnand %p1326_p6, %p1314_p8  ;;  %p1334_p5 = scmp.lt.s32.totalorder %s1332_s7, %s1325_s12 }
  0x5d   : > { %1041 = dma.hbm_to_vmem [thread:$0]  (!%p1761_p7), %s2193_s0, 32, %s185_s27, [#allocation6]  }
  0x5e   : > { %p1329_p2 = pneg %p1328_p0  ;;  %p1335_p12 = por %p1334_p5, %p1333_p10 }
  0x60   : > { %p1336_p3 = pnand %p1335_p12, %p1329_p2 }
  0x62   : > { %1339 = shalt.err (!%p1336_p3)
}
  0x63   : > { %s1515_s5 = smov 384   ;;  %s1516_s0 = smov 128  }
  0x64   : > { %s1517_s27 = smov 8   ;;  %245 = sbr.rel (%p1744_p11) target bundleno = 657 (0x291), region = 36 }
  0x65   : > { %1048 = dma.hbm_to_vmem [thread:$0]  (!%p1752_p9), %s1769_s4, 4096, %s234_s11, %s1681_s25, %s1515_s5, %s1516_s0, %s1517_s27  }
  0x66   : > { %s247_s6 = sand.u32 (!%p1744_p11), 1, %s1689_s10   ;;  %s249_s16 = sand.u32 (!%p1744_p11), 1, %s1476_s22  }
  0x67   : > { %s949_s7 = sshll.u32 (!%p1744_p11), %s249_s16, 7  ;;  %s248_s18 = scalar_lea.sflag (!%p1744_p11), [#allocation3], %s247_s6 }
  0x68   : > { %s1788_s8 = scalar_lea.vmem (!%p1744_p11), [#allocation2], %s949_s7 }
  0x69   : > { %1431 = dma.done.wait (%p1700_p13), %s248_s18, 2048  }
  0x6a   : > { %1433 = vsyncadd (%p1700_p13), %s248_s18, 4294965248  ;;  %p2194_p8 = scmp.eq.s32.totalorder %s1689_s10, 0 }
  0x6c   : > { %1435 = dma.done.wait (%p2194_p8), [#allocation6], 32   ;;  %p2195_p9 = pmov %p2194_p8 }
  0x6d   : > { %s262_s25 = sand.u32 1, %s1464_s19  }
  0x6e   : > { %1437 = vsyncadd (%p2195_p9), [#allocation6], 4294967264  ;;  %s951_s26 = sshll.u32 %s262_s25, 8 }
  0x6f   : > { %s1799_s3 = scalar_lea.vmem [#allocation7], %s951_s26 }
  0x70   : > { %1439 = dma.done.wait (%p1719_p1), %s248_s18, 4096  }
  0x71   : > { %1441 = vsyncadd (%p1719_p1), %s248_s18, 4294963200  ;;  %v1806_v0 = vld [vmem:[%s1788_s8] sm:$0xff]  ;;  %v1809_v1 = vld [vmem:[%s1788_s8 + $0x8] sm:$0xff]  ;;  %s2196_s21 = sld [smem:[#allocation25_spill]]  ;;  %p2202_p13 = scmp.ne.s32.totalorder %s2186_s9, 0 }
  0x72   : > { %v1812_v2 = vld [vmem:[%s1788_s8 + $0x40] sm:$0xff]  ;;  %v316_v3 = vadd.f32 %v1809_v1, %v1806_v0  ;;  %v1817_v4 = vld [vmem:[%s1788_s8 + $0x48] sm:$0xff]  ;;  %v1820_v5 = vld [vmem:[%s1788_s8 + $0x10] sm:$0xff]  ;;  %s2197_s4 = sld [smem:[#allocation14_spill]] }
  0x73   : > { %v1823_v6 = vld [vmem:[%s1788_s8 + $0x18] sm:$0xff]  ;;  %v328_v7 = vadd.f32 %v1817_v4, %v1812_v2  ;;  %v1828_v8 = vld [vmem:[%s1788_s8 + $0x50] sm:$0xff]  ;;  %v1838_v12 = vld [vmem:[%s1788_s8 + $0x20] sm:$0xff]  ;;  %s2198_s11 = sld [smem:[#allocation17_spill]] }
  0x74   : > { %v1831_v9 = vld [vmem:[%s1788_s8 + $0x58] sm:$0xff]  ;;  %317 = vadd.xlane.f32.xlu0 %v316_v3  ;;  %v319_v10 = vadd.f32 %v1823_v6, %v1820_v5  ;;  %v1841_v13 = vld [vmem:[%s1788_s8 + $0x28] sm:$0xff]  ;;  %v1844_v14 = vld [vmem:[%s1788_s8 + $0x30] sm:$0xff]  ;;  %s2199_s12 = sld [smem:[#allocation16_spill]] }
  0x75   : > { %329 = vadd.xlane.f32.xlu1 %v328_v7  ;;  %v331_v11 = vadd.f32 %v1831_v9, %v1828_v8  ;;  %v1847_v15 = vld [vmem:[%s1788_s8 + $0x38] sm:$0xff]  ;;  %v1850_v16 = vld [vmem:[%s1788_s8 + $0x60] sm:$0xff]  ;;  %v1853_v17 = vld [vmem:[%s1788_s8 + $0x68] sm:$0xff]  ;;  %v322_v18 = vadd.f32 %v1841_v13, %v1838_v12  ;;  %s2200_s13 = sld [smem:[#allocation18_spill]] }
  0x76   : > { %v1858_v19 = vld [vmem:[%s1788_s8 + $0x70] sm:$0xff]  ;;  %v1861_v20 = vld [vmem:[%s1788_s8 + $0x78] sm:$0xff]  ;;  %v325_v21 = vadd.f32 %v1847_v15, %v1844_v14  ;;  %v334_v22 = vadd.f32 %v1853_v17, %v1850_v16  ;;  %v1199_v27 = vld [vmem:[%s1799_s3 + $0x60] ss:$8 sps:$4 sm:$0xff]   ;;  %s2201_s10 = sld [smem:[#allocation27_spill]] }
  0x77   : > { %v337_v23 = vadd.f32 %v1861_v20, %v1858_v19  ;;  %v1194_v24 = vld [vmem:[%s1799_s3 + $0x74] ss:$8 sps:$4 sm:$0xff]   ;;  %v1196_v25 = vld [vmem:[%s1799_s3 + $0x70] ss:$8 sps:$4 sm:$0xff]   ;;  %v1197_v26 = vld [vmem:[%s1799_s3 + $0x64] ss:$8 sps:$4 sm:$0xff]  }
  0x78   : > { %320 = vadd.xlane.f32.xlu0 %v319_v10  ;;  %699 = vmatprep.subr.bf16.mxu0 %v1194_v24  ;;  %v1200_v28 = vld [vmem:[%s1799_s3 + $0x54] ss:$8 sps:$4 sm:$0xff]   ;;  %v1202_v29 = vld [vmem:[%s1799_s3 + $0x50] ss:$8 sps:$4 sm:$0xff]   ;;  %v1203_v30 = vld [vmem:[%s1799_s3 + $0x44] ss:$8 sps:$4 sm:$0xff]  }
  0x79   : > { %332 = vadd.xlane.f32.xlu1 %v331_v11  ;;  %994 = vmatprep.subr.bf16.mxu1 %v1194_v24  ;;  %v1205_v31 = vld [vmem:[%s1799_s3 + $0x40] ss:$8 sps:$4 sm:$0xff]   ;;  %v1206_v32 = vld [vmem:[%s1799_s3 + $0x34] ss:$8 sps:$4 sm:$0xff]   ;;  %v1208_v33 = vld [vmem:[%s1799_s3 + $0x30] ss:$8 sps:$4 sm:$0xff]  }
  0x7a   : > { %700 = vmatpush1.bf16.msra.mxu0 %v1196_v25  ;;  %1010 = vmatpush1.bf16.msra.mxu1 %v1196_v25  ;;  %v1209_v34 = vld [vmem:[%s1799_s3 + $0x24] ss:$8 sps:$4 sm:$0xff]   ;;  %v1211_v35 = vld [vmem:[%s1799_s3 + $0x20] ss:$8 sps:$4 sm:$0xff]   ;;  %v1212_v36 = vld [vmem:[%s1799_s3 + $0x14] ss:$8 sps:$4 sm:$0xff]  }
  0x7b   : > { %701 = vmatprep.subr.bf16.mxu0 %v1197_v26  ;;  %995 = vmatprep.subr.bf16.mxu1 %v1197_v26  ;;  %v1214_v37 = vld [vmem:[%s1799_s3 + $0x10] ss:$8 sps:$4 sm:$0xff]   ;;  %v1215_v38 = vld [vmem:[%s1799_s3 + $0x4] ss:$8 sps:$4 sm:$0xff]   ;;  %v1217_v39 = vld [vmem:[%s1799_s3] ss:$8 sps:$4 sm:$0xff]  }
  0x7c   : > { %323 = vadd.xlane.f32.xlu0 %v322_v18  ;;  %v1218_v40 = vld [vmem:[%s1799_s3 + $0xf4] ss:$8 sps:$4 sm:$0xff]   ;;  %s291_s2 = sand.u32 1, %s2197_s4   ;;  %s1026_s27 = smul.u32 48, %s2198_s11 }
  0x7d   : > { %326 = vadd.xlane.f32.xlu1 %v325_v21  ;;  %s952_s5 = sshll.u32 %s291_s2, 7  ;;  %s987_s6 = sshll.u32 %s2199_s12, 1 }
  0x7e   : > { %702 = vmatpush1.bf16.msra.mxu0 %v1199_v27  ;;  %1011 = vmatpush1.bf16.msra.mxu1 %v1199_v27  ;;  %s2033_s0 = scalar_lea.vmem [#allocation8], %s952_s5  ;;  %s1027_s16 = smul.u32 96, %s2200_s13 }
  0x7f   : > { %703 = vmatprep.subr.bf16.mxu0 %v1200_v28  ;;  %996 = vmatprep.subr.bf16.mxu1 %v1200_v28  ;;  %s802_s7 = sadd.s32 %s1026_s27, %s987_s6  ;;  %s807_s25 = sshll.u32 %s2033_s0, 4  ;;  %s2058_s25 = int_to_ptr.vmem [resolvable:$true] %s807_s25 }
  0x80   : > { %335 = vadd.xlane.f32.xlu0 %v334_v22  ;;  %s804_s18 = sadd.s32 %s1027_s16, %s802_s7  ;;  %s1340_s11 = scalar_lea.vmem %s2058_s25, 2048 }
  0x81   : > { %338 = vadd.xlane.f32.xlu1 %v337_v23  ;;  %s989_s8 = sshll.u32 %s804_s18, 7  ;;  %p1341_p11 = scmp.ne.s32.totalorder %s2058_s25, %s1340_s11 }
  0x82   : > { %704 = vmatpush1.bf16.msra.mxu0 %v1202_v29  ;;  %1012 = vmatpush1.bf16.msra.mxu1 %v1202_v29  ;;  %s2056_s14 = scalar_lea.hbm %s2201_s10, %s989_s8  ;;  %s1518_s12 = smov [#allocation8]  }
  0x83   : > { %705 = vmatprep.subr.bf16.mxu0 %v1203_v30  ;;  %997 = vmatprep.subr.bf16.mxu1 %v1203_v30  ;;  %p1342_p1 = pnand %p1341_p11, %p2202_p13  ;;  %s1344_s13 = sshll.u32 %s1518_s12, 4  ;;  %s1345_s13 = int_to_ptr.vmem [resolvable:$false] %s1344_s13 }
  0x84   : > { %s1346_s5 = scalar_lea.vmem %s1345_s13, 4096  ;;  %p1347_p4 = scmp.lt.s32.totalorder %s2058_s25, %s1345_s13 }
  0x85   : > { %p1343_p7 = pneg %p1342_p1  ;;  %p1348_p6 = scmp.lt.s32.totalorder %s1346_s5, %s1340_s11 }
  0x86   : > { %706 = vmatpush1.bf16.msra.mxu0 %v1205_v31  ;;  %1013 = vmatpush1.bf16.msra.mxu1 %v1205_v31 }
  0x87   : > { %707 = vmatprep.subr.bf16.mxu0 %v1206_v32  ;;  %998 = vmatprep.subr.bf16.mxu1 %v1206_v32  ;;  %v1220_v32 = vld [vmem:[%s1799_s3 + $0xf0] ss:$8 sps:$4 sm:$0xff]   ;;  %p1349_p0 = por %p1348_p6, %p1347_p4 }
  0x89   : > { %p1350_p2 = pnand %p1349_p0, %p1343_p7 }
  0x8a   : > { %708 = vmatpush1.bf16.msra.mxu0 %v1208_v33  ;;  %1014 = vmatpush1.bf16.msra.mxu1 %v1208_v33  ;;  %v1221_v33 = vld [vmem:[%s1799_s3 + $0xe4] ss:$8 sps:$4 sm:$0xff]  }
  0x8b   : > { %709 = vmatprep.subr.bf16.mxu0 %v1209_v34  ;;  %999 = vmatprep.subr.bf16.mxu1 %v1209_v34 }
  0x8e   : > { %710 = vmatpush1.bf16.msra.mxu0 %v1211_v35  ;;  %1015 = vmatpush1.bf16.msra.mxu1 %v1211_v35  ;;  %v1223_v35 = vld [vmem:[%s1799_s3 + $0xe0] ss:$8 sps:$4 sm:$0xff]  }
  0x8f   : > { %711 = vmatprep.subr.bf16.mxu0 %v1212_v36  ;;  %1000 = vmatprep.subr.bf16.mxu1 %v1212_v36  ;;  %v1224_v36 = vld [vmem:[%s1799_s3 + $0xd4] ss:$8 sps:$4 sm:$0xff]  }
  0x92   : > { %712 = vmatpush1.bf16.msra.mxu0 %v1214_v37  ;;  %1016 = vmatpush1.bf16.msra.mxu1 %v1214_v37  ;;  %v1226_v37 = vld [vmem:[%s1799_s3 + $0xd0] ss:$8 sps:$4 sm:$0xff]  }
  0x93   : > { %713 = vmatprep.subr.bf16.mxu0 %v1215_v38  ;;  %1001 = vmatprep.subr.bf16.mxu1 %v1215_v38  ;;  %v1227_v38 = vld [vmem:[%s1799_s3 + $0xc4] ss:$8 sps:$4 sm:$0xff]  }
  0x96   : > { %714 = vmatpush1.bf16.msra.mxu0 %v1217_v39  ;;  %1017 = vmatpush1.bf16.msra.mxu1 %v1217_v39  ;;  %v1229_v39 = vld [vmem:[%s1799_s3 + $0xc0] ss:$8 sps:$4 sm:$0xff]  }
  0x97   : > { %715 = vmatprep.subr.bf16.mxu0 %v1218_v40  ;;  %1002 = vmatprep.subr.bf16.mxu1 %v1218_v40  ;;  %v1230_v40 = vld [vmem:[%s1799_s3 + $0xb4] ss:$8 sps:$4 sm:$0xff]  }
  0x9a   : > { %716 = vmatpush2.bf16.msra.mxu0 %v1220_v32  ;;  %1018 = vmatpush2.bf16.msra.mxu1 %v1220_v32 }
  0x9b   : > { %717 = vmatprep.subr.bf16.mxu0 %v1221_v33  ;;  %1003 = vmatprep.subr.bf16.mxu1 %v1221_v33 }
  0x9e   : > { %718 = vmatpush2.bf16.msra.mxu0 %v1223_v35  ;;  %1019 = vmatpush2.bf16.msra.mxu1 %v1223_v35 }
  0x9f   : > { %719 = vmatprep.subr.bf16.mxu0 %v1224_v36  ;;  %1004 = vmatprep.subr.bf16.mxu1 %v1224_v36 }
  0xa2   : > { %720 = vmatpush2.bf16.msra.mxu0 %v1226_v37  ;;  %1020 = vmatpush2.bf16.msra.mxu1 %v1226_v37 }
  0xa3   : > { %721 = vmatprep.subr.bf16.mxu0 %v1227_v38  ;;  %1005 = vmatprep.subr.bf16.mxu1 %v1227_v38 }
  0xa6   : > { %722 = vmatpush2.bf16.msra.mxu0 %v1229_v39  ;;  %1021 = vmatpush2.bf16.msra.mxu1 %v1229_v39 }
  0xa7   : > { %723 = vmatprep.subr.bf16.mxu0 %v1230_v40  ;;  %1006 = vmatprep.subr.bf16.mxu1 %v1230_v40 }
  0xfd   : > { %v318_v41 = vpop.xlane.xlu0 %317 }
  0xfe   : > { %v341_v42 = vmul.f32 0.00390625, %v318_v41  ;;  %v330_v43 = vpop.xlane.xlu1 %329  ;;  %v1232_v41 = vld [vmem:[%s1799_s3 + $0xb0] ss:$8 sps:$4 sm:$0xff]  }
  0xff   : > { %v345_v44 = vmul.f32 0.00390625, %v330_v43  ;;  %724 = vmatpush2.bf16.msra.mxu0 %v1232_v41  ;;  %1022 = vmatpush2.bf16.msra.mxu1 %v1232_v41  ;;  %v1235_v43 = vld [vmem:[%s1799_s3 + $0xa0] ss:$8 sps:$4 sm:$0xff]  }
 0x100   : > { %v1887_v45 = vsub.f32 %v1806_v0, %v341_v42  ;;  %v1890_v46 = vsub.f32 %v1809_v1, %v341_v42  ;;  %v1233_v42 = vld [vmem:[%s1799_s3 + $0xa4] ss:$8 sps:$4 sm:$0xff]  }
 0x101   : > { %v1893_v47 = vsub.f32 %v1812_v2, %v345_v44  ;;  %v1896_v48 = vsub.f32 %v1817_v4, %v345_v44  ;;  %v321_v49 = vpop.xlane.xlu0 %320  ;;  %725 = vmatprep.subr.bf16.mxu0 %v1233_v42  ;;  %1007 = vmatprep.subr.bf16.mxu1 %v1233_v42  ;;  %v1236_v44 = vld [vmem:[%s1799_s3 + $0x94] ss:$8 sps:$4 sm:$0xff]  }
 0x102   : > { %v342_v50 = vmul.f32 0.00390625, %v321_v49  ;;  %v333_v51 = vpop.xlane.xlu1 %332  ;;  %v365_v52 = vmul.f32 %v1887_v45, %v1887_v45  ;;  %v366_v53 = vmul.f32 %v1890_v46, %v1890_v46  ;;  %v1238_v49 = vld [vmem:[%s1799_s3 + $0x90] ss:$8 sps:$4 sm:$0xff]  }
 0x103   : > { %v346_v54 = vmul.f32 0.00390625, %v333_v51  ;;  %v373_v55 = vmul.f32 %v1893_v47, %v1893_v47  ;;  %v374_v56 = vmul.f32 %v1896_v48, %v1896_v48  ;;  %726 = vmatpush2.bf16.msra.mxu0 %v1235_v43  ;;  %1023 = vmatpush2.bf16.msra.mxu1 %v1235_v43  ;;  %v1241_v51 = vld [vmem:[%s1799_s3 + $0x80] ss:$8 sps:$4 sm:$0xff]  }
 0x104   : > { %v1907_v57 = vsub.f32 %v1820_v5, %v342_v50  ;;  %v1910_v58 = vsub.f32 %v1823_v6, %v342_v50  ;;  %v381_v59 = vadd.f32 %v366_v53, %v365_v52  ;;  %727 = vmatprep.subr.bf16.mxu0 %v1236_v44  ;;  %1008 = vmatprep.subr.bf16.mxu1 %v1236_v44  ;;  %v1239_v50 = vld [vmem:[%s1799_s3 + $0x84] ss:$8 sps:$4 sm:$0xff]  }
 0x105   : > { %v1913_v60 = vsub.f32 %v1828_v8, %v346_v54  ;;  %v1916_v61 = vsub.f32 %v1831_v9, %v346_v54  ;;  %v324_v62 = vpop.xlane.xlu0 %323  ;;  %v393_v1 = vadd.f32 %v374_v56, %v373_v55 }
 0x106   : > { %v343_v63 = vmul.f32 0.00390625, %v324_v62  ;;  %382 = vadd.xlane.f32.xlu0 %v381_v59  ;;  %v327_v0 = vpop.xlane.xlu1 %326  ;;  %v367_v2 = vmul.f32 %v1907_v57, %v1907_v57  ;;  %v368_v3 = vmul.f32 %v1910_v58, %v1910_v58 }
 0x107   : > { %v344_v4 = vmul.f32 0.00390625, %v327_v0  ;;  %v375_v5 = vmul.f32 %v1913_v60, %v1913_v60  ;;  %v376_v6 = vmul.f32 %v1916_v61, %v1916_v61  ;;  %728 = vmatpush2.bf16.msra.mxu0 %v1238_v49  ;;  %1024 = vmatpush2.bf16.msra.mxu1 %v1238_v49 }
 0x108   : > { %v1927_v7 = vsub.f32 %v1838_v12, %v343_v63  ;;  %v1930_v8 = vsub.f32 %v1841_v13, %v343_v63  ;;  %v384_v9 = vadd.f32 %v368_v3, %v367_v2  ;;  %729 = vmatprep.subr.bf16.mxu0 %v1239_v50  ;;  %1009 = vmatprep.subr.bf16.mxu1 %v1239_v50  ;;  %v446_v63 = vlaneseq }
 0x109   : > { %v1933_v10 = vsub.f32 %v1844_v14, %v344_v4  ;;  %v1936_v11 = vsub.f32 %v1847_v15, %v344_v4  ;;  %v336_v18 = vpop.xlane.xlu0 %335  ;;  %v396_v23 = vadd.f32 %v376_v6, %v375_v5 }
 0x10a   : > { %v347_v21 = vmul.f32 0.00390625, %v336_v18  ;;  %394 = vadd.xlane.f32.xlu0 %v393_v1  ;;  %385 = vadd.xlane.f32.xlu1 %v384_v9  ;;  %v339_v22 = vpop.xlane.xlu1 %338  ;;  %v369_v12 = vmul.f32 %v1927_v7, %v1927_v7  ;;  %v370_v13 = vmul.f32 %v1930_v8, %v1930_v8  ;;  %v447_v6 = vshrl.u32 %v446_v63, 7 }
 0x10b   : > { %v348_v24 = vmul.f32 0.00390625, %v339_v22  ;;  %v371_v14 = vmul.f32 %v1933_v10, %v1933_v10  ;;  %v372_v15 = vmul.f32 %v1936_v11, %v1936_v11  ;;  %730 = vmatpush2.bf16.msra.mxu0 %v1241_v51  ;;  %1025 = vmatpush2.bf16.msra.mxu1 %v1241_v51 }
 0x10c   : > { %v1947_v25 = vsub.f32 %v1850_v16, %v347_v21  ;;  %v1950_v26 = vsub.f32 %v1853_v17, %v347_v21  ;;  %v387_v27 = vadd.f32 %v370_v13, %v369_v12  ;;  %v448_v13 = vsub.s32 0, %v447_v6 }
 0x10d   : > { %v1953_v28 = vsub.f32 %v1858_v19, %v348_v24  ;;  %v1956_v29 = vsub.f32 %v1861_v20, %v348_v24  ;;  %v390_v30 = vadd.f32 %v372_v15, %v371_v14  ;;  %v452_v24 = vsub.s32 1, %v447_v6 }
 0x10e   : > { %397 = vadd.xlane.f32.xlu1 %v396_v23  ;;  %388 = vadd.xlane.f32.xlu0 %v387_v27  ;;  %v377_v31 = vmul.f32 %v1947_v25, %v1947_v25  ;;  %v378_v16 = vmul.f32 %v1950_v26, %v1950_v26  ;;  %v314_v27 = vld [vmem:[#allocation5] sm:$0x3] }
 0x10f   : > { %v379_v17 = vmul.f32 %v1953_v28, %v1953_v28  ;;  %v380_v19 = vmul.f32 %v1956_v29, %v1956_v29  ;;  %v1981_v32 = vrot.slane %v314_v27, %v448_v13 }
 0x110   : > { %v399_v20 = vadd.f32 %v378_v16, %v377_v31 }
 0x111   : > { %v402_v34 = vadd.f32 %v380_v19, %v379_v17  ;;  %v1983_v17 = vrot.slane %v314_v27, %v452_v24 }
 0x112   : > { %391 = vadd.xlane.f32.xlu1 %v390_v30  ;;  %400 = vadd.xlane.f32.xlu0 %v399_v20  ;;  %v315_v20 = vld [vmem:[%s2196_s21] sm:$0x3]  ;;  %s2064_s21 = scalar_lea.sflag [#allocation4], %s291_s2 }
 0x113   : > { %v1991_v37 = vrot.slane %v315_v20, %v448_v13  ;;  %v480_v38 = vrot.slane %v315_v20, %v452_v24 }
 0x116   : > { %403 = vadd.xlane.f32.xlu1 %v402_v34 }
 0x18f   : > { %v383_v52 = vpop.xlane.xlu0 %382 }
 0x190   : > { %v405_v53 = vmul.f32 0.00390625, %v383_v52 }
 0x192   : > { %v413_v54 = vadd.f32 1e-05, %v405_v53 }
 0x193   : > { %v386_v55 = vpop.xlane.xlu1 %385  ;;  %v395_v56 = vpop.xlane.xlu0 %394 }
 0x194   : > { %1242 = vrsqrt.f32 %v413_v54  ;;  %v406_v59 = vmul.f32 0.00390625, %v386_v55  ;;  %v409_v62 = vmul.f32 0.00390625, %v395_v56 }
 0x196   : > { %v414_v0 = vadd.f32 1e-05, %v406_v59  ;;  %v417_v1 = vadd.f32 1e-05, %v409_v62 }
 0x197   : > { %v398_v2 = vpop.xlane.xlu1 %397  ;;  %v389_v3 = vpop.xlane.xlu0 %388 }
 0x198   : > { %1244 = vrsqrt.f32 %v414_v0  ;;  %v410_v4 = vmul.f32 0.00390625, %v398_v2  ;;  %v407_v5 = vmul.f32 0.00390625, %v389_v3 }
 0x199   : > { %1246 = vrsqrt.f32 %v417_v1 }
 0x19a   : > { %v418_v9 = vadd.f32 1e-05, %v410_v4  ;;  %v415_v18 = vadd.f32 1e-05, %v407_v5 }
 0x19b   : > { %v392_v21 = vpop.xlane.xlu1 %391  ;;  %v401_v22 = vpop.xlane.xlu0 %400 }
 0x19c   : > { %1248 = vrsqrt.f32 %v418_v9  ;;  %v408_v23 = vmul.f32 0.00390625, %v392_v21  ;;  %v411_v12 = vmul.f32 0.00390625, %v401_v22 }
 0x19d   : > { %1250 = vrsqrt.f32 %v415_v18 }
 0x19e   : > { %v416_v14 = vadd.f32 1e-05, %v408_v23  ;;  %v419_v15 = vadd.f32 1e-05, %v411_v12 }
 0x19f   : > { %v404_v30 = vpop.xlane.xlu1 %403 }
 0x1a0   : > { %1252 = vrsqrt.f32 %v416_v14  ;;  %v412_v31 = vmul.f32 0.00390625, %v404_v30 }
 0x1a1   : > { %v1243_v16 = vpop.eup %1242  ;;  %1254 = vrsqrt.f32 %v419_v15 }
 0x1a2   : > { %v420_v19 = vadd.f32 1e-05, %v412_v31  ;;  %v430_v33 = vmul.f32 %v1243_v16, %v1890_v46  ;;  %v429_v34 = vmul.f32 %v1243_v16, %v1887_v45 }
 0x1a4   : > { %1256 = vrsqrt.f32 %v420_v19  ;;  %v457_v36 = vmul.f32 %v1983_v17, %v430_v33  ;;  %v456_v39 = vmul.f32 %v1981_v32, %v429_v34 }
 0x1a5   : > { %v1245_v35 = vpop.eup %1244 }
 0x1a6   : > { %v1247_v40 = vpop.eup %1246  ;;  %v432_v41 = vmul.f32 %v1245_v35, %v1910_v58  ;;  %v431_v42 = vmul.f32 %v1245_v35, %v1907_v57  ;;  %v484_v50 = vadd.f32 %v480_v38, %v457_v36  ;;  %v483_v51 = vadd.f32 %v1991_v37, %v456_v39 }
 0x1a7   : > { %v438_v43 = vmul.f32 %v1247_v40, %v1896_v48  ;;  %v437_v46 = vmul.f32 %v1247_v40, %v1893_v47 }
 0x1a8   : > { %v459_v45 = vmul.f32 %v1983_v17, %v432_v41  ;;  %v458_v44 = vmul.f32 %v1981_v32, %v431_v42 }
 0x1a9   : > { %v1249_v49 = vpop.eup %1248  ;;  %v465_v52 = vmul.f32 %v1983_v17, %v438_v43  ;;  %v464_v53 = vmul.f32 %v1981_v32, %v437_v46 }
 0x1aa   : > { %v1251_v54 = vpop.eup %1250  ;;  %v486_v58 = vadd.f32 %v480_v38, %v459_v45  ;;  %v485_v57 = vadd.f32 %v1991_v37, %v458_v44  ;;  %v440_v48 = vmul.f32 %v1249_v49, %v1916_v61  ;;  %v439_v47 = vmul.f32 %v1249_v49, %v1913_v60 }
 0x1ab   : > { %v434_v55 = vmul.f32 %v1251_v54, %v1930_v8  ;;  %v433_v56 = vmul.f32 %v1251_v54, %v1927_v7  ;;  %v492_v2 = vadd.f32 %v480_v38, %v465_v52  ;;  %v491_v3 = vadd.f32 %v1991_v37, %v464_v53 }
 0x1ac   : > { %v500_v59 = vpack.c.bf16 %v486_v58, %v484_v50  ;;  %v499_v62 = vpack.c.bf16 %v485_v57, %v483_v51  ;;  %v467_v63 = vmul.f32 %v1983_v17, %v440_v48  ;;  %v466_v0 = vmul.f32 %v1981_v32, %v439_v47 }
 0x1ad   : > { %v1253_v1 = vpop.eup %1252  ;;  %v461_v4 = vmul.f32 %v1983_v17, %v434_v55  ;;  %v460_v61 = vmul.f32 %v1981_v32, %v433_v56 }
 0x1ae   : > { %v1255_v5 = vpop.eup %1254  ;;  %731 = vmatprep.mubr.bf16.mxu0 %v500_v59  ;;  %v494_v60 = vadd.f32 %v480_v38, %v467_v63  ;;  %v493_v8 = vadd.f32 %v1991_v37, %v466_v0  ;;  %v436_v7 = vmul.f32 %v1253_v1, %v1936_v11  ;;  %v435_v6 = vmul.f32 %v1253_v1, %v1933_v10 }
 0x1af   : > { %732 = vmatmul.mubr.bf16.vlgmr.msra.gmra.mxu0 %v499_v62  ;;  %v442_v9 = vmul.f32 %v1255_v5, %v1950_v26  ;;  %v441_v18 = vmul.f32 %v1255_v5, %v1947_v25  ;;  %v488_v24 = vadd.f32 %v480_v38, %v461_v4  ;;  %v487_v14 = vadd.f32 %v1991_v37, %v460_v61 }
 0x1b0   : > { %v504_v21 = vpack.c.bf16 %v494_v60, %v492_v2  ;;  %v503_v22 = vpack.c.bf16 %v493_v8, %v491_v3  ;;  %v463_v23 = vmul.f32 %v1983_v17, %v436_v7  ;;  %v462_v12 = vmul.f32 %v1981_v32, %v435_v6 }
 0x1b1   : > { %v1257_v13 = vpop.eup %1256  ;;  %v469_v15 = vmul.f32 %v1983_v17, %v442_v9  ;;  %v468_v11 = vmul.f32 %v1981_v32, %v441_v18 }
 0x1b2   : > { %751 = vmatprep.mubr.bf16.mxu1 %v504_v21  ;;  %v490_v10 = vadd.f32 %v480_v38, %v463_v23  ;;  %v489_v26 = vadd.f32 %v1991_v37, %v462_v12  ;;  %v444_v25 = vmul.f32 %v1257_v13, %v1956_v29  ;;  %v443_v27 = vmul.f32 %v1257_v13, %v1953_v28 }
 0x1b3   : > { %752 = vmatmul.mubr.bf16.vlgmr.msra.gmra.mxu1 %v503_v22  ;;  %v496_v20 = vadd.f32 %v480_v38, %v469_v15  ;;  %v495_v34 = vadd.f32 %v1991_v37, %v468_v11 }
 0x1b4   : > { %v502_v30 = vpack.c.bf16 %v490_v10, %v488_v24  ;;  %v501_v31 = vpack.c.bf16 %v489_v26, %v487_v14  ;;  %v471_v16 = vmul.f32 %v1983_v17, %v444_v25  ;;  %v470_v19 = vmul.f32 %v1981_v32, %v443_v27 }
 0x1b6   : > { %741 = vmatprep.mubr.bf16.mxu0 %v502_v30  ;;  %v498_v33 = vadd.f32 %v480_v38, %v471_v16  ;;  %v497_v29 = vadd.f32 %v1991_v37, %v470_v19 }
 0x1b7   : > { %742 = vmatmul.mubr.bf16.gmra.mxu0 %v501_v31 }
 0x1b8   : > { %v506_v28 = vpack.c.bf16 %v498_v33, %v496_v20  ;;  %v505_v35 = vpack.c.bf16 %v497_v29, %v495_v34 }
 0x1ba   : > { %761 = vmatprep.mubr.bf16.mxu1 %v506_v28 }
 0x1bb   : > { %762 = vmatmul.mubr.bf16.gmra.mxu1 %v505_v35 }
 0x26f   : > { %v733_v17 = vpop.f32.mrf.mxu0 }
 0x270   : > { %772 = vst [vmem:[%s2033_s0] sm:$0xff] %v733_v17 }
 0x271   : > { %v735_v32 = vpop.f32.mrf.mxu0 }
 0x272   : > { %773 = vst [vmem:[%s2033_s0 + $0x8] sm:$0xff] %v735_v32 }
 0x273   : > { %v737_v36 = vpop.f32.mrf.mxu0  ;;  %v753_v37 = vpop.f32.mrf.mxu1 }
 0x274   : > { %774 = vst [vmem:[%s2033_s0 + $0x10] sm:$0xff] %v737_v36  ;;  %780 = vst [vmem:[%s2033_s0 + $0x40] sm:$0xff] %v753_v37 }
 0x275   : > { %v739_v38 = vpop.f32.mrf.mxu0  ;;  %v755_v39 = vpop.f32.mrf.mxu1 }
 0x276   : > { %775 = vst [vmem:[%s2033_s0 + $0x18] sm:$0xff] %v739_v38  ;;  %781 = vst [vmem:[%s2033_s0 + $0x48] sm:$0xff] %v755_v39 }
 0x277   : > { %v743_v40 = vpop.f32.mrf.mxu0  ;;  %v757_v41 = vpop.f32.mrf.mxu1 }
 0x278   : > { %776 = vst [vmem:[%s2033_s0 + $0x20] sm:$0xff] %v743_v40  ;;  %782 = vst [vmem:[%s2033_s0 + $0x50] sm:$0xff] %v757_v41 }
 0x279   : > { %v745_v42 = vpop.f32.mrf.mxu0  ;;  %v759_v43 = vpop.f32.mrf.mxu1 }
 0x27a   : > { %777 = vst [vmem:[%s2033_s0 + $0x28] sm:$0xff] %v745_v42  ;;  %783 = vst [vmem:[%s2033_s0 + $0x58] sm:$0xff] %v759_v43 }
 0x27b   : > { %v747_v46 = vpop.f32.mrf.mxu0  ;;  %v763_v45 = vpop.f32.mrf.mxu1 }
 0x27c   : > { %778 = vst [vmem:[%s2033_s0 + $0x30] sm:$0xff] %v747_v46  ;;  %784 = vst [vmem:[%s2033_s0 + $0x60] sm:$0xff] %v763_v45 }
 0x27d   : > { %v749_v44 = vpop.f32.mrf.mxu0  ;;  %v765_v49 = vpop.f32.mrf.mxu1 }
 0x27e   : > { %779 = vst [vmem:[%s2033_s0 + $0x38] sm:$0xff] %v749_v44  ;;  %785 = vst [vmem:[%s2033_s0 + $0x68] sm:$0xff] %v765_v49 }
 0x27f   : > { %v767_v50 = vpop.f32.mrf.mxu1 }
 0x280   : > { %786 = vst [vmem:[%s2033_s0 + $0x70] sm:$0xff] %v767_v50 }
 0x281   : > { %v769_v51 = vpop.f32.mrf.mxu1 }
 0x282   : > { %787 = vst [vmem:[%s2033_s0 + $0x78] sm:$0xff] %v769_v51 }
 0x283   : > { %1353 = shalt.err (!%p1350_p2)
}
 0x284   : > { %s1354_s4 = scalar_lea.hbm %s2056_s14, 2048  ;;  %s1358_s27 = scalar_lea.hbm %s2201_s10, 24576 }
 0x285   : > { %p1355_p10 = scmp.ne.s32.totalorder %s2056_s14, %s1354_s4  ;;  %p1359_p3 = scmp.lt.s32.totalorder %s2056_s14, %s2201_s10 }
 0x286   : > { %p1360_p8 = scmp.lt.s32.totalorder %s1358_s27, %s1354_s4 }
 0x287   : > { %p1356_p5 = pnand %p1355_p10, %p2202_p13 }
 0x288   : > { %p1361_p9 = por %p1360_p8, %p1359_p3 }
 0x289   : > { %p1357_p12 = pneg %p1356_p5 }
 0x28b   : > { %p1362_p11 = pnand %p1361_p9, %p1357_p12 }
 0x28d   : > { %1365 = shalt.err (!%p1362_p11)
}
 0x28e   : > { %s1519_s7 = smov 256   ;;  %s1520_s18 = smov 768  }
 0x28f   : > { %s1521_s8 = smov 16  }
 0x290   : > { %1036 = dma.vmem_to_hbm [thread:$0]  (%p2202_p13), %s2058_s25, 2048, %s2056_s14, %s2064_s21, %s1519_s7, %s1520_s18, %s1521_s8  }
 0x291 PF: > { %s2203_s26 = sld [smem:[#allocation13_spill]]  ;;  %p1056_p1 = scmp.ge.s32.totalorder %s1508_s30, 2 }
 0x292   : > { %p2204_p7 = scmp.ne.s32.totalorder %s2187_s24, 0 }
 0x294   : > { %p1050_p4 = pnand %p1056_p1, %p2204_p7 }
 0x296   : > { %p1051_p6 = pneg %p1050_p4 }
 0x297   : > { %s822_s3 = sand.u32 1, %s2203_s26  }
 0x298   : > { %s823_s11 = scalar_lea.sflag [#allocation4], %s822_s3 }
 0x299   : > { %1443 = dma.done.wait (%p1051_p6), %s823_s11, 2048  }
 0x29a   : > { %1445 = vsyncadd (%p1051_p6), %s823_s11, 4294965248  ;;  %s21_s30 = sadd.s32 1, %s1508_s30   ;;  %s2206_s9 = sld [smem:[#allocation14_spill]] }
 0x29b   : > { %p2092_p0 = scmp.ge.s32.totalorder %s21_s30, 14   ;;  %s2207_s16 = sld [smem:[#allocation15_spill]] }
 0x29c   : > { %s2208_s25 = smov %s1709_s15  ;;  %s2209_s24 = sld [smem:[#allocation19_spill]] }
 0x29d   : > { %s2210_s27 = sld [smem:[#allocation20_spill]]  ;;  %s2214_s18 = smov %s1464_s19 }
 0x29e   : > { %s2211_s14 = sld [smem:[#allocation21_spill]]  ;;  %s2215_s19 = smov %s1468_s20 }
 0x29f   : > { %s2212_s13 = sld [smem:[#allocation22_spill]]  ;;  %s2216_s20 = smov %s2208_s25 }
 0x2a0   : > { %s2213_s15 = smov %s2206_s9  ;;  %s2217_s21 = smov %s1476_s22 }
 0x2a1   : > { %s2218_s22 = smov %s1480_s23  ;;  %s2219_s23 = smov %s1668_s1 }
 0x2a2   : > { %s2220_s25 = smov %s1500_s28  ;;  %s2221_s26 = smov %s1504_s29 }
 0x2a3   :  { %20 = sbr.rel (!%p2092_p0) target bundleno = 18 (0x12), region = 96 }
 0x2a4   : > { %s2222_s28 = smov %s2211_s14 }
 0x2a5   : > { %s2223_s29 = smov %s2212_s13 }
 0x2a8   :  { %828 = vsyncpa [#allocation3], 1 }
 0x2a9   :  { %830 = vsyncpa [#allocation3 + $0x1], 1 }
 0x2aa   :  { %831 = vsyncpa [#allocation6], 1 }
 0x2ab   :  { %832 = vsyncpa [#allocation4], 1 }
 0x2ac   :  { %834 = vsyncpa [#allocation4 + $0x1], 1 }

</bundles_post_ra>
